<compile_context>
chip_gen: v5e
topology: v5e:2x2
jax: 0.10.0
libtpu: 0.0.40
codegen_flags: <defaults>
</compile_context>

<pallas_src>
import functools

import jax
import jax.numpy as jnp
from jax.experimental import pallas as pl
from jax.experimental.pallas import tpu as pltpu

LANE = 128          # TPU lane width; output feature dim is padded to this.
TILE_B = 1024       # batch tile for the gridded (large-B) path.


def _task_encoder_kernel(x_ref, w_ref, b_ref, o_ref):
    # x_ref: (tile_b, T)    task input tile
    # w_ref: (T, I_pad)     pre-transposed, lane-padded weight (constant per call)
    # b_ref: (1, I_pad)     lane-padded bias
    # o_ref: (tile_b, I_pad) lane-dense output tile
    acc = jnp.dot(x_ref[...], w_ref[...], preferred_element_type=jnp.float32)
    # Bias add + final cast kept in f32 on the VPU (v5e-safe); downcast only at store.
    o_ref[...] = (acc + b_ref[...].astype(jnp.float32)).astype(o_ref.dtype)


def prepare_task_encoder_params(weight, bias):
    """One-time parameter prep (do this at init, NOT per forward call).

    weight: (input_size, task_size)  -- native nn.Linear layout
    bias:   (input_size,)
    Returns (w_t_pad, b_pad): W^T padded to (task_size, I_pad), bias as (1, I_pad),
    with I_pad = ceil(input_size / 128) * 128 so the kernel output is lane-dense.
    """
    out_features, task_size = weight.shape
    assert bias.shape == (out_features,)
    i_pad = max(LANE, ((out_features + LANE - 1) // LANE) * LANE)
    w_t_pad = jnp.zeros((task_size, i_pad), dtype=weight.dtype)
    w_t_pad = w_t_pad.at[:, :out_features].set(weight.T)
    b_pad = jnp.zeros((1, i_pad), dtype=bias.dtype)
    b_pad = b_pad.at[0, :out_features].set(bias)
    return w_t_pad, b_pad


@functools.partial(jax.jit, static_argnames=("out_features",))
def task_encoder_forward(task, w_t_pad, b_pad, *, out_features):
    """y = task @ W^T + bias  (== torch.nn.Linear(task_size, input_size)).

    task:     (B, task_size)
    w_t_pad:  (task_size, I_pad)   from prepare_task_encoder_params
    b_pad:    (1, I_pad)
    Returns (B, out_features).
    """
    B, T = task.shape
    T2, I_pad = w_t_pad.shape
    assert T == T2, "task_size mismatch"
    assert b_pad.shape == (1, I_pad), "bias size mismatch"
    assert out_features <= I_pad

    cost = pl.CostEstimate(
        flops=2 * B * T * I_pad,
        transcendentals=0,
        bytes_accessed=task.dtype.itemsize * (B * T + T * I_pad + I_pad + B * I_pad),
    )
    out_shape = jax.ShapeDtypeStruct((B, I_pad), task.dtype)

    if B <= TILE_B:
        # Gridless: full arrays as single VMEM blocks, no pipeline machinery.
        # (No explicit B padding — a (2,8) f32 block already sublane-pads into
        #  one (8,128) vreg for free.)
        vmem = pl.BlockSpec(memory_space=pltpu.MemorySpace.VMEM)
        out_pad = pl.pallas_call(
            _task_encoder_kernel,
            out_shape=out_shape,
            in_specs=[vmem, vmem, vmem],
            out_specs=vmem,
            cost_estimate=cost,
        )(task, w_t_pad, b_pad)
    else:
        # Large-B path: 1-D grid over batch tiles.  Weight/bias use a constant
        # index_map so they are DMA'd once and stay VMEM-resident; the batch
        # axis is "parallel" so v7x shards it across both TensorCores.
        # Working set (double-buffered) ~1 MiB << scoped VMEM default on all chips,
        # so no vmem_limit_bytes override is needed.
        grid = (pl.cdiv(B, TILE_B),)
        out_pad = pl.pallas_call(
            _task_encoder_kernel,
            out_shape=out_shape,
            grid_spec=pltpu.PrefetchScalarGridSpec(
                num_scalar_prefetch=0,
                grid=grid,
                in_specs=[
                    pl.BlockSpec((TILE_B, T), lambda i: (i, 0)),
                    pl.BlockSpec((T, I_pad), lambda i: (0, 0)),
                    pl.BlockSpec((1, I_pad), lambda i: (0, 0)),
                ],
                out_specs=pl.BlockSpec((TILE_B, I_pad), lambda i: (i, 0)),
            ),
            compiler_params=pltpu.CompilerParams(
                dimension_semantics=("parallel",),
            ),
            cost_estimate=cost,
        )(task, w_t_pad, b_pad)

    # Slice the lane-padded activation back to the module's output size.
    return out_pad[:, :out_features]


if __name__ == "__main__":
    # Module config: TaskEncoder(input_size, hidden_size, task_size)
    # hidden_size is unused by the forward pass.
    batch = 2
    task_size = 8
    input_size = 32

    key = jax.random.PRNGKey(0)
    k_task, k_w, k_b, k_big = jax.random.split(key, 4)

    task = jax.random.normal(k_task, (batch, task_size), dtype=jnp.float32)

    # Deterministic parameter init mimicking nn.Linear's uniform(-1/sqrt(fan_in), 1/sqrt(fan_in)).
    bound = 1.0 / (task_size ** 0.5)
    weight = jax.random.uniform(
        k_w, (input_size, task_size), dtype=jnp.float32, minval=-bound, maxval=bound
    )
    bias = jax.random.uniform(
        k_b, (input_size,), dtype=jnp.float32, minval=-bound, maxval=bound
    )

    # One-time parameter prep (transpose + lane padding) — done outside the hot path.
    w_t_pad, b_pad = prepare_task_encoder_params(weight, bias)

    # Small-batch (gridless) path — the module's nominal shape.
    out = task_encoder_forward(task, w_t_pad, b_pad, out_features=input_size)
    out = jax.block_until_ready(out)
    ref = task @ weight.T + bias
    assert out.shape == (batch, input_size)
    assert jnp.allclose(out, ref, atol=1e-5, rtol=1e-5), "small-batch mismatch vs reference"

    # Large-batch (gridded, batch-parallel) path sanity check.
    big_batch = 2048
    task_big = jax.random.normal(k_big, (big_batch, task_size), dtype=jnp.float32)
    out_big = task_encoder_forward(task_big, w_t_pad, b_pad, out_features=input_size)
    out_big = jax.block_until_ready(out_big)
    ref_big = task_big @ weight.T + bias
    assert out_big.shape == (big_batch, input_size)
    assert jnp.allclose(out_big, ref_big, atol=1e-4, rtol=1e-4), "large-batch mismatch vs reference"

    print("KERNEL_OK")
</pallas_src>

<mosaic_0001>
module attributes {stable_mosaic.version = 11 : i64} {
  func.func @_task_encoder_kernel(%arg0: memref<2x8xf32, #tpu.memory_space<vmem>>, %arg1: memref<8x128xf32, #tpu.memory_space<vmem>>, %arg2: memref<1x128xf32, #tpu.memory_space<vmem>>, %arg3: memref<2x128xf32, #tpu.memory_space<vmem>>) attributes {dimension_semantics = [], scalar_prefetch = 0 : i64, scratch_operands = 0 : i64, tpu.core_type = #tpu.core_type<tc>} {
    %c0 = arith.constant 0 : index
    %c0_0 = arith.constant 0 : index
    %0 = vector.load %arg0[%c0, %c0_0] : memref<2x8xf32, #tpu.memory_space<vmem>>, vector<2x8xf32>
    %c0_1 = arith.constant 0 : index
    %c0_2 = arith.constant 0 : index
    %1 = vector.load %arg1[%c0_1, %c0_2] : memref<8x128xf32, #tpu.memory_space<vmem>>, vector<8x128xf32>
    %cst = arith.constant dense<0.000000e+00> : vector<2x128xf32>
    %2 = tpu.matmul %0, %1, %cst {dimension_numbers = #tpu.dot_dimension_numbers<[1], [0], [0], [1], [0, 0, 1, 1], [], []>} : vector<2x8xf32>, vector<8x128xf32>, vector<2x128xf32> -> vector<2x128xf32>
    %c0_3 = arith.constant 0 : index
    %c0_4 = arith.constant 0 : index
    %3 = vector.load %arg2[%c0_3, %c0_4] : memref<1x128xf32, #tpu.memory_space<vmem>>, vector<1x128xf32>
    %4 = vector.broadcast %3 : vector<1x128xf32> to vector<2x128xf32>
    %5 = arith.addf %2, %4 : vector<2x128xf32>
    %c0_5 = arith.constant 0 : index
    %c0_6 = arith.constant 0 : index
    %6 = vector.load %arg3[%c0_5, %c0_6] : memref<2x128xf32, #tpu.memory_space<vmem>>, vector<2x128xf32>
    tpu.vector_store %arg3[%c0_5, %c0_6], %5 {strides = array<i32>} : memref<2x128xf32, #tpu.memory_space<vmem>>, vector<2x128xf32>,
    return
  }
}

</mosaic_0001>

<bundles_post_ra>
// kernel: task_encoder_forward.1
= control target key start
LH: loop header
LB: loop body
LE: loop exit
PB: predicated region body
PF: predicated region fallthrough
CT: control target
= control target key end

     0   :  { %8 = vsyncpa [#allocation3], 0  ;;  %s210_s0 = inlined_call_operand.hbm [shape: f32[2,8], index: 0, kind: input, shape index: {}]   ;;  %s211_s1 = inlined_call_operand.hbm [shape: f32[8,128], index: 1, kind: input, shape index: {}]   ;;  %s212_s2 = inlined_call_operand.vmem [shape: f32[1,128], index: 2, kind: input, shape index: {}]   ;;  %s213_s3 = inlined_call_operand.hbm [shape: f32[2,128], index: 3, kind: output, shape index: {}]  }
   0x1   :  { %9 = vsyncpa [#allocation6], 0 }
   0x2   :  { %10 = vsyncpa [#allocation4], 0  ;;  %s16_s14 = sshll.u32 %s210_s0, 4  ;;  %s175_s15 = smov [#allocation2]   ;;  %s17_s14 = int_to_ptr.hbm [resolvable:$true] %s16_s14 }
   0x3   :  { %s18_s16 = sshll.u32 %s175_s15, 4  ;;  %s27_s19 = sshll.u32 %s211_s1, 4  ;;  %s19_s16 = int_to_ptr.vmem [resolvable:$true] %s18_s16  ;;  %s28_s19 = int_to_ptr.hbm [resolvable:$true] %s27_s19 }
   0x4   :  { %21 = dma.hbm_to_vmem [thread:$0]  %s17_s14, 32, %s19_s16, [#allocation3]  }
   0x5   :  { %s176_s20 = smov [#allocation5]  }
   0x6   :  { %s29_s21 = sshll.u32 %s176_s20, 4  ;;  %s30_s21 = int_to_ptr.vmem [resolvable:$true] %s29_s21 }
   0x7   :  { %32 = dma.hbm_to_vmem [thread:$0]  %s28_s19, 128, %s30_s21, [#allocation6]  }
   0x8   :  { %169 = dma.done.wait [#allocation3], 32  }
   0x9   :  { %170 = vsyncadd [#allocation3], 4294967264 }
   0xa   :  { %171 = dma.done.wait [#allocation6], 128  }
   0xb   :  { %172 = vsyncadd [#allocation6], 4294967168  ;;  %vm49_vm0 = vcmask 64512   ;;  %v44_v0 = vld [vmem:[#allocation5] sm:$0xff]  ;;  %v43_v1 = vld [vmem:[#allocation2] sm:$0x3] }
   0xc   :  { %68 = vmatpush.msra.mxu0 %v44_v0  ;;  %v96_v2 = vld [vmem:[%s212_s2] ss:$0 sm:$0xff]  ;;  %s177_s1 = smov [#allocation7]   ;;  %s81_s26 = sshll.u32 %s213_s3, 4  ;;  %s82_s26 = int_to_ptr.hbm [resolvable:$true] %s81_s26 }
   0xd   :  { %92 = vmatmul.msk.f32.vlgmr.msra.gmra.mxu0 %vm49_vm0, %v43_v1  ;;  %s79_s23 = sshll.u32 %s177_s1, 4  ;;  %s80_s23 = int_to_ptr.vmem [resolvable:$true] %s79_s23 }
  0x8a   :  { %v70_v3 = vpop.f32.mrf.mxu0 }
  0x8b   :  { %v71_v4 = vadd.f32 %v96_v2, %v70_v3 }
  0x8d   :  { %73 = vst [vmem:[#allocation7] sm:$0x3] %v71_v4 }
  0x8e   :  { %84 = dma.vmem_to_hbm [thread:$0]  %s80_s23, 32, %s82_s26, [#allocation4]  }
  0x8f   :  { %173 = dma.done.wait [#allocation4], 32  }
  0x90   :  { %174 = vsyncadd [#allocation4], 4294967264 }
  0x91   :  { %89 = vsyncpa [#allocation3], 1 }
  0x92   :  { %90 = vsyncpa [#allocation6], 1 }
  0x93   :  { %91 = vsyncpa [#allocation4], 1 }

</bundles_post_ra>
